<compile_context>
chip_gen: v5e
topology: v5e:2x2
jax: 0.10.0
libtpu: 0.0.40
codegen_flags: <defaults>
</compile_context>

<pallas_src>
import math
import functools

import jax
import jax.numpy as jnp
from jax import lax
from jax.experimental import pallas as pl
from jax.experimental.pallas import tpu as pltpu

ARCFACE_SCALE = 30.0
ARCFACE_MARGIN = 0.5
_NORM_EPS = 1e-12          # matches F.normalize default eps

# VMEM budgeting — conservative for v7x (64 MiB physical); v5e/v6e have 128 MiB.
_VMEM_DATA_BUDGET = 40 * 1024 * 1024   # double-buffered operand + output tiles
_VMEM_LIMIT_BYTES = 48 * 1024 * 1024   # scoped limit handed to Mosaic
_TILE_B_MAX = 1024
_TILE_C_MAX = 2048


def _round_up(x, m):
    return (x + m - 1) // m * m


def _inv_l2_norm(x):
    """Inverse row L2 norm with F.normalize semantics: 1 / max(||x||, eps)."""
    return lax.rsqrt(jnp.maximum(jnp.sum(x * x, axis=1), _NORM_EPS * _NORM_EPS))


def _select_tiles(B, C, D_pad):
    """Pick (tile_b, tile_c) under the VMEM data budget.

    Prefers a single batch tile (weight then streams from HBM exactly once);
    otherwise uses ceil-balanced tiles to minimize pad waste.
    """
    B8 = _round_up(B, 8)
    C128 = _round_up(C, 128)

    # ---- batch tile: emb tile (double-buffered bf16) gets <= 1/4 of budget.
    emb_budget = _VMEM_DATA_BUDGET // 4
    tb_cap = max(8, min(_TILE_B_MAX, (emb_budget // (4 * D_pad)) // 8 * 8))
    if B8 <= tb_cap:
        nb, tile_b = 1, B8
    else:
        nb = -(-B8 // tb_cap)
        tile_b = _round_up(-(-B8 // nb), 8)
    B_pad = nb * tile_b

    # ---- class tile: fill remaining budget (weight 2x bf16 + out 2x f32).
    emb_bytes = 2 * tile_b * D_pad * 2
    remaining = max(_VMEM_DATA_BUDGET - emb_bytes, 0)
    per_c = 4 * D_pad + 8 * tile_b            # VMEM bytes per unit of tile_c
    tc_cap = max(128, min(_TILE_C_MAX, (remaining // per_c) // 128 * 128))
    if C128 <= tc_cap:
        nc, tile_c = 1, C128
    else:
        nc = -(-C128 // tc_cap)
        tile_c = _round_up(-(-C128 // nc), 128)
    C_pad = nc * tile_c

    return tile_b, tile_c, B_pad, C_pad, nb, nc


# ---------------------------------------------------------------------------
# Kernels (inputs are pre-normalized bf16 rows; MXU accumulates in f32)
# ---------------------------------------------------------------------------
def _arcface_train_kernel(emb_ref, w_ref, labels_ref, out_ref, *,
                          scale, cos_m, sin_m, tile_c):
    j = pl.program_id(1)
    # NT matmul on the MXU: (tb, D) x (tc, D) contracting D, f32 accumulation.
    cosine = lax.dot_general(
        emb_ref[...], w_ref[...],
        dimension_numbers=(((1,), (1,)), ((), ())),
        preferred_element_type=jnp.float32,
    )
    # Global column index of this C-tile; mask hits at most one col per row.
    cols = j * tile_c + lax.broadcasted_iota(jnp.int32, cosine.shape, 1)
    mask = cols == labels_ref[...]                       # (tb, tc)
    # Per-row label cosine via a masked row-reduce (XLU slot, not VALU).
    cos_l = jnp.sum(jnp.where(mask, cosine, 0.0), axis=1, keepdims=True)
    # Clamp so f32 rounding (|cosine| slightly > 1) can never NaN the sqrt.
    sin_l = jnp.sqrt(jnp.clip(1.0 - cos_l * cos_l, 0.0, 1.0))
    phi = cos_l * cos_m - sin_l * sin_m                  # (tb, 1)
    out_ref[...] = jnp.where(mask, phi, cosine) * scale


def _arcface_infer_kernel(emb_ref, w_ref, out_ref, *, scale):
    dots = lax.dot_general(
        emb_ref[...], w_ref[...],
        dimension_numbers=(((1,), (1,)), ((), ())),
        preferred_element_type=jnp.float32,
    )
    out_ref[...] = dots * scale


# ---------------------------------------------------------------------------
# Wrapper
# ---------------------------------------------------------------------------
def arcface_forward(embeddings, weight, labels=None,
                    scale=ARCFACE_SCALE, margin=ARCFACE_MARGIN):
    """Pallas implementation of ArcFaceLayer.forward.

    embeddings: [B, D] float, weight: [C, D] float, labels: optional int [B].
    Returns f32[B, C].
    """
    B, D = embeddings.shape
    C, D2 = weight.shape
    assert D == D2

    emb32 = embeddings.astype(jnp.float32)
    w32 = weight.astype(jnp.float32)

    # --- tiling ------------------------------------------------------------
    D_pad = _round_up(D, 128)
    tile_b, tile_c, B_pad, C_pad, nb, nc = _select_tiles(B, C, D_pad)
    grid = (nb, nc)

    # --- normalize rows in f32, cast to bf16, pad to aligned shapes ---------
    # (single fused XLA pass over each operand; norms folded in for free)
    inv_e = _inv_l2_norm(emb32)                       # (B,)
    inv_w = _inv_l2_norm(w32)                         # (C,)
    emb_n = (emb32 * inv_e[:, None]).astype(jnp.bfloat16)
    w_n = (w32 * inv_w[:, None]).astype(jnp.bfloat16)
    if (B_pad, D_pad) != (B, D):
        emb_n = jnp.pad(emb_n, ((0, B_pad - B), (0, D_pad - D)))
    if (C_pad, D_pad) != (C, D):
        w_n = jnp.pad(w_n, ((0, C_pad - C), (0, D_pad - D)))

    out_shape = jax.ShapeDtypeStruct((B_pad, C_pad), jnp.float32)
    emb_spec = pl.BlockSpec((tile_b, D_pad), lambda i, j: (i, 0))
    w_spec = pl.BlockSpec((tile_c, D_pad), lambda i, j: (j, 0))
    out_spec = pl.BlockSpec((tile_b, tile_c), lambda i, j: (i, j))

    # Megacore split on the class axis (disjoint weight streams per core).
    compiler_params = pltpu.CompilerParams(
        dimension_semantics=("arbitrary", "parallel"),
        vmem_limit_bytes=_VMEM_LIMIT_BYTES)

    # emb tile is resident across the inner (C) grid axis -> read once;
    # weight is re-streamed once per B tile; output written once.
    bytes_accessed = (2 * B_pad * D_pad
                      + 2 * C_pad * D_pad * nb
                      + 4 * B_pad * C_pad)

    if labels is None:
        kernel = functools.partial(_arcface_infer_kernel, scale=float(scale))
        out = pl.pallas_call(
            kernel,
            out_shape=out_shape,
            grid=grid,
            in_specs=[emb_spec, w_spec],
            out_specs=out_spec,
            compiler_params=compiler_params,
            cost_estimate=pl.CostEstimate(
                flops=2 * B_pad * C_pad * D_pad,
                transcendentals=0,
                bytes_accessed=bytes_accessed),
        )(emb_n, w_n)
        return out[:B, :C]

    # Pad labels with -1 so padded batch rows never match any column.
    labels_col = labels.astype(jnp.int32).reshape(B, 1)
    if B_pad != B:
        labels_col = jnp.pad(labels_col, ((0, B_pad - B), (0, 0)),
                             constant_values=-1)
    labels_spec = pl.BlockSpec((tile_b, 1), lambda i, j: (i, 0))

    kernel = functools.partial(
        _arcface_train_kernel,
        scale=float(scale),
        cos_m=math.cos(margin),
        sin_m=math.sin(margin),
        tile_c=tile_c,
    )
    out = pl.pallas_call(
        kernel,
        out_shape=out_shape,
        grid=grid,
        in_specs=[emb_spec, w_spec, labels_spec],
        out_specs=out_spec,
        compiler_params=compiler_params,
        cost_estimate=pl.CostEstimate(
            flops=2 * B_pad * C_pad * D_pad,
            transcendentals=B_pad * nc,     # sqrt only on the (tb,1) label vector
            bytes_accessed=bytes_accessed),
    )(emb_n, w_n, labels_col)
    return out[:B, :C]


# ---------------------------------------------------------------------------
# Pure-JAX references (for correctness checks)
# ---------------------------------------------------------------------------
def _reference_forward(embeddings, weight, labels=None,
                       scale=ARCFACE_SCALE, margin=ARCFACE_MARGIN,
                       mxu_dtype=jnp.float32):
    """Mirrors the PyTorch module.  With mxu_dtype=bfloat16 it also mirrors
    the kernel's numerics (normalize in f32, bf16 MXU operands, f32 acc)."""
    emb32 = embeddings.astype(jnp.float32)
    w32 = weight.astype(jnp.float32)
    emb_n = emb32 * _inv_l2_norm(emb32)[:, None]
    w_n = w32 * _inv_l2_norm(w32)[:, None]
    cosine = jnp.dot(emb_n.astype(mxu_dtype), w_n.astype(mxu_dtype).T,
                     preferred_element_type=jnp.float32)
    if labels is None:
        return cosine * scale
    sine = jnp.sqrt(jnp.clip(1.0 - cosine * cosine, 0.0, 1.0))
    phi = cosine * math.cos(margin) - sine * math.sin(margin)
    one_hot = jax.nn.one_hot(labels, cosine.shape[1], dtype=cosine.dtype)
    return (one_hot * phi + (1.0 - one_hot) * cosine) * scale


if __name__ == "__main__":
    # Small shapes consistent with the module:
    #   batch B=8, in_features D=32, out_features (num speakers) C=16
    B, D, C = 8, 32, 16

    key = jax.random.PRNGKey(0)
    k_emb, k_w, k_lab = jax.random.split(key, 3)

    embeddings = jax.random.normal(k_emb, (B, D), dtype=jnp.float32)

    # Deterministic xavier_uniform_-style init for weight (C, D):
    bound = math.sqrt(6.0 / (D + C))
    weight = jax.random.uniform(k_w, (C, D), dtype=jnp.float32,
                                minval=-bound, maxval=bound)

    labels = jax.random.randint(k_lab, (B,), 0, C, dtype=jnp.int32)

    # Labeled (training/margin) path
    out_train = jax.block_until_ready(arcface_forward(embeddings, weight, labels))
    # Unlabeled (inference) path
    out_infer = jax.block_until_ready(arcface_forward(embeddings, weight, None))

    # Tight check against a reference using the same numerics as the kernel
    # (normalize in f32, bf16 MXU operands, f32 accumulation and epilogue).
    ref_train_bf = _reference_forward(embeddings, weight, labels,
                                      mxu_dtype=jnp.bfloat16)
    ref_infer_bf = _reference_forward(embeddings, weight, None,
                                      mxu_dtype=jnp.bfloat16)
    assert jnp.allclose(out_train, ref_train_bf, atol=1e-3, rtol=1e-3)
    assert jnp.allclose(out_infer, ref_infer_bf, atol=1e-3, rtol=1e-3)

    # Looser check against full-f32 PyTorch-style math (bf16 MXU operands
    # bound the cosine error by ~2^-8, scaled by s=30).
    ref_train = _reference_forward(embeddings, weight, labels)
    ref_infer = _reference_forward(embeddings, weight, None)
    assert jnp.allclose(out_train, ref_train, atol=2.5e-1, rtol=2e-2)
    assert jnp.allclose(out_infer, ref_infer, atol=2.5e-1, rtol=2e-2)

    print("KERNEL_OK")
</pallas_src>

<mosaic_0001>
module attributes {stable_mosaic.version = 11 : i64} {
  func.func @_arcface_train_kernel(%arg0: i32, %arg1: i32, %arg2: memref<8x128xbf16, #tpu.memory_space<vmem>>, %arg3: memref<128x128xbf16, #tpu.memory_space<vmem>>, %arg4: memref<8x1xi32, #tpu.memory_space<vmem>>, %arg5: memref<8x128xf32, #tpu.memory_space<vmem>>) attributes {dimension_semantics = [#tpu.dimension_semantics<arbitrary>, #tpu.dimension_semantics<parallel>], iteration_bounds = array<i64: 1, 1>, scalar_prefetch = 0 : i64, scratch_operands = 0 : i64, tpu.core_type = #tpu.core_type<tc>, window_params = [{transform_indices = @transform_0, window_bounds = array<i64: 8, 128>}, {transform_indices = @transform_1, window_bounds = array<i64: 128, 128>}, {transform_indices = @transform_2, window_bounds = array<i64: 8, 1>}, {transform_indices = @transform_3, window_bounds = array<i64: 8, 128>}]} {
    %c0 = arith.constant 0 : index
    %c0_0 = arith.constant 0 : index
    %0 = vector.load %arg2[%c0, %c0_0] : memref<8x128xbf16, #tpu.memory_space<vmem>>, vector<8x128xbf16>
    %c0_1 = arith.constant 0 : index
    %c0_2 = arith.constant 0 : index
    %1 = vector.load %arg3[%c0_1, %c0_2] : memref<128x128xbf16, #tpu.memory_space<vmem>>, vector<128x128xbf16>
    %cst = arith.constant dense<0.000000e+00> : vector<8x128xf32>
    %2 = tpu.matmul %0, %1, %cst {dimension_numbers = #tpu.dot_dimension_numbers<[1], [1], [0], [0], [0, 0, 1, 0], [], []>} : vector<8x128xbf16>, vector<128x128xbf16>, vector<8x128xf32> -> vector<8x128xf32>
    %c128_i32 = arith.constant 128 : i32
    %3 = arith.muli %arg1, %c128_i32 : i32
    %4 = tpu.iota {dimensions = array<i32: 1>} : vector<8x128xi32>
    %5 = vector.broadcast %3 : i32 to vector<8x128xi32>
    %6 = arith.addi %5, %4 : vector<8x128xi32>
    %c0_3 = arith.constant 0 : index
    %c0_4 = arith.constant 0 : index
    %7 = vector.load %arg4[%c0_3, %c0_4] : memref<8x1xi32, #tpu.memory_space<vmem>>, vector<8x1xi32>
    %8 = vector.broadcast %7 : vector<8x1xi32> to vector<8x128xi32>
    %9 = arith.cmpi eq, %6, %8 : vector<8x128xi32>
    %cst_5 = arith.constant 0.000000e+00 : f32
    %10 = vector.broadcast %cst_5 : f32 to vector<8x128xf32>
    %11 = arith.select %9, %2, %10 : vector<8x128xi1>, vector<8x128xf32>
    %cst_6 = arith.constant dense<0.000000e+00> : vector<8xf32>
    %12 = vector.multi_reduction <add>, %11, %cst_6 [1] : vector<8x128xf32> to vector<8xf32>
    %13 = vector.shape_cast %12 : vector<8xf32> to vector<8x1xf32>
    %14 = arith.mulf %13, %13 : vector<8x1xf32>
    %cst_7 = arith.constant 1.000000e+00 : f32
    %15 = vector.broadcast %cst_7 : f32 to vector<8x1xf32>
    %16 = arith.subf %15, %14 : vector<8x1xf32>
    %cst_8 = arith.constant 0.000000e+00 : f32
    %cst_9 = arith.constant 1.000000e+00 : f32
    %17 = vector.broadcast %cst_8 : f32 to vector<8x1xf32>
    %18 = arith.maximumf %17, %16 : vector<8x1xf32>
    %19 = vector.broadcast %cst_9 : f32 to vector<8x1xf32>
    %20 = arith.minimumf %19, %18 : vector<8x1xf32>
    %21 = math.sqrt %20 : vector<8x1xf32>
    %cst_10 = arith.constant 0.87758255 : f32
    %22 = vector.broadcast %cst_10 : f32 to vector<8x1xf32>
    %23 = arith.mulf %13, %22 : vector<8x1xf32>
    %cst_11 = arith.constant 0.47942555 : f32
    %24 = vector.broadcast %cst_11 : f32 to vector<8x1xf32>
    %25 = arith.mulf %21, %24 : vector<8x1xf32>
    %26 = arith.subf %23, %25 : vector<8x1xf32>
    %27 = vector.shape_cast %26 : vector<8x1xf32> to vector<8x1xf32>
    %28 = vector.broadcast %27 : vector<8x1xf32> to vector<8x128xf32>
    %29 = arith.select %9, %28, %2 : vector<8x128xi1>, vector<8x128xf32>
    %cst_12 = arith.constant 3.000000e+01 : f32
    %30 = vector.broadcast %cst_12 : f32 to vector<8x128xf32>
    %31 = arith.mulf %29, %30 : vector<8x128xf32>
    %c0_13 = arith.constant 0 : index
    %c0_14 = arith.constant 0 : index
    %32 = vector.load %arg5[%c0_13, %c0_14] : memref<8x128xf32, #tpu.memory_space<vmem>>, vector<8x128xf32>
    tpu.vector_store %arg5[%c0_13, %c0_14], %31 {strides = array<i32>} : memref<8x128xf32, #tpu.memory_space<vmem>>, vector<8x128xf32>,
    return
  }
  func.func @transform_0(%arg0: i32, %arg1: i32) -> (i32, i32) {
    %c0_i32 = arith.constant 0 : i32
    %c0_i32_0 = arith.constant 0 : i32
    return %arg0, %c0_i32 : i32, i32
  }
  func.func @transform_1(%arg0: i32, %arg1: i32) -> (i32, i32) {
    %c0_i32 = arith.constant 0 : i32
    %c0_i32_0 = arith.constant 0 : i32
    return %arg1, %c0_i32 : i32, i32
  }
  func.func @transform_2(%arg0: i32, %arg1: i32) -> (i32, i32) {
    %c0_i32 = arith.constant 0 : i32
    %c0_i32_0 = arith.constant 0 : i32
    return %arg0, %c0_i32 : i32, i32
  }
  func.func @transform_3(%arg0: i32, %arg1: i32) -> (i32, i32) {
    %c0_i32 = arith.constant 0 : i32
    return %arg0, %arg1 : i32, i32
  }
}

</mosaic_0001>

<bundles_post_ra>
// kernel: tpu_custom_call.1
= control target key start
LH: loop header
LB: loop body
LE: loop exit
PB: predicated region body
PF: predicated region fallthrough
CT: control target
= control target key end

     0   :  { %8 = vsyncpa [#allocation3], 0  ;;  %s300_s0 = inlined_call_operand.vmem [shape: bf16[8,128], index: 0, kind: input, shape index: {}]   ;;  %s301_s1 = inlined_call_operand.hbm [shape: bf16[128,128], index: 1, kind: input, shape index: {}]   ;;  %s302_s2 = inlined_call_operand.vmem [shape: s32[8,1], index: 2, kind: input, shape index: {}]   ;;  %s303_s3 = inlined_call_operand.hbm [shape: f32[8,128], index: 3, kind: output, shape index: {}]  }
   0x1   :  { %9 = vsyncpa [#allocation4], 0  ;;  %s16_s14 = sshll.u32 %s301_s1, 4  ;;  %s261_s15 = smov [#allocation2]   ;;  %s17_s14 = int_to_ptr.hbm [resolvable:$true] %s16_s14 }
   0x2   :  { %s18_s16 = sshll.u32 %s261_s15, 4  ;;  %s262_s17 = smov 64   ;;  %s19_s16 = int_to_ptr.vmem [resolvable:$true] %s18_s16 }
   0x3   :  { %s263_s18 = smov 4  }
   0x4   :  { %24 = dma.hbm_to_vmem [thread:$0]  %s17_s14, 1024, %s19_s16, [#allocation3], %s262_s17, %s262_s17, %s263_s18  }
   0x5   :  { %257 = dma.done.wait [#allocation3], 1024  }
   0x6   :  { %258 = vsyncadd [#allocation3], 4294966272  ;;  %v200_v0 = vld [vmem:[#allocation2 + $0x38] sm:$0xff]  ;;  %v199_v1 = vld [vmem:[#allocation2 + $0x30] sm:$0xff]  ;;  %v264_v6 = vmov 0   ;;  %v110_v11 = vlaneseq  ;;  %s151_s24 = sshll.u32 %s303_s3, 4  ;;  %s152_s24 = int_to_ptr.hbm [resolvable:$true] %s151_s24 }
   0x7   :  { %96 = vmatpush.bf16.xpose.msra.mxu0 %v200_v0  ;;  %v198_v2 = vld [vmem:[#allocation2 + $0x28] sm:$0xff]  ;;  %v197_v3 = vld [vmem:[#allocation2 + $0x20] sm:$0xff]  ;;  %v196_v4 = vld [vmem:[#allocation2 + $0x18] sm:$0xff]  ;;  %206 = vset.pattern.permute.xlu0 %v264_v6 }
   0x8   :  { %v114_v5 = vld [vmem:[%s302_s2] sm:$0xff]  ;;  %v195_v7 = vld [vmem:[#allocation2 + $0x10] sm:$0xff]  ;;  %v194_v8 = vld [vmem:[#allocation2 + $0x8] sm:$0xff]  ;;  %v111_v12 = vand.u32 127, %v110_v11 }
   0x9   :  { %116 = vperm.xlu0 %206, %v114_v5   ;;  %v193_v9 = vld [vmem:[#allocation2] sm:$0xff] }
   0xa   :  { %v31_v10 = vld [vmem:[%s300_s0] sm:$0xf]  ;;  %s265_s0 = smov [#allocation5]  }
   0xb   :  { %s149_s2 = sshll.u32 %s265_s0, 4  ;;  %s150_s2 = int_to_ptr.vmem [resolvable:$true] %s149_s2 }
   0xf   :  { %97 = vmatpush.bf16.xpose.msra.mxu0 %v199_v1 }
  0x17   :  { %98 = vmatpush.bf16.xpose.msra.mxu0 %v198_v2 }
  0x1f   :  { %99 = vmatpush.bf16.xpose.msra.mxu0 %v197_v3 }
  0x27   :  { %100 = vmatpush.bf16.xpose.msra.mxu0 %v196_v4 }
  0x2f   :  { %101 = vmatpush.bf16.xpose.msra.mxu0 %v195_v7 }
  0x37   :  { %102 = vmatpush.bf16.xpose.msra.mxu0 %v194_v8 }
  0x3f   :  { %103 = vmatpush.bf16.xpose.msra.mxu0 %v193_v9 }
  0x46   :  { %104 = vmatmul.bf16.vlgmr.msra.gmra.mxu0 %v31_v10 }
  0x7b   :  { %v117_v13 = vpop.permute.xlu0 %116 }
  0x7c   :  { %vm118_vm0 = vcmp.eq.s32.totalorder %v111_v12, %v117_v13 }
  0xc3   :  { %v105_v14 = vpop.f32.mrf.mxu0 }
  0xc4   :  { %v119_v15 = vsel %vm118_vm0, %v105_v14, 0.0 }
  0xc5   :  { %120 = vadd.xlane.f32.xlu0 %v119_v15 }
  0xcb   :  { %v107_v16 = vpop.f32.mrf.mxu0 }
 0x138   :  { %v121_v17 = vpop.xlane.xlu0 %120 }
 0x139   :  { %v122_v18 = vmul.f32 %v121_v17, %v121_v17  ;;  %v138_v32 = vmul.f32 0.87758255, %v121_v17 }
 0x13b   :  { %v123_v19 = vsub.f32 1.0, %v122_v18 }
 0x13d   :  { %v124_v20 = vmax.f32 %v123_v19, 0.0 }
 0x13f   :  { %v125_v21 = vmin.f32 %v124_v20, 1.0 }
 0x141   :  { %207 = vrsqrt.f32 %v125_v21  ;;  %vm133_vm1 = vcmp.eq.f32.partialorder %v125_v21, inf  ;;  %v136_v29 = vand.u32 2147483648, %v125_v21  ;;  %vm135_vm2 = vcmp.eq.f32.partialorder %v125_v21, 0.0 }
 0x147   :  { %v208_v22 = vpop.eup %207 }
 0x148   :  { %v127_v23 = vmul.f32 %v208_v22, %v125_v21 }
 0x14a   :  { %v128_v24 = vmul.f32 %v208_v22, %v127_v23 }
 0x14c   :  { %v129_v25 = vmul.f32 0.5, %v128_v24 }
 0x14e   :  { %v130_v26 = vsub.f32 1.5, %v129_v25 }
 0x150   :  { %v131_v27 = vmul.f32 %v208_v22, %v130_v26 }
 0x152   :  { %v132_v28 = vmul.f32 %v131_v27, %v125_v21 }
 0x154   :  { %v134_v30 = vsel %vm133_vm1, %v125_v21, %v132_v28 }
 0x155   :  { %v137_v31 = vsel %vm135_vm2, %v136_v29, %v134_v30 }
 0x156   :  { %v139_v33 = vmul.f32 0.47942555, %v137_v31 }
 0x158   :  { %v140_v34 = vsub.f32 %v138_v32, %v139_v33 }
 0x15a   :  { %v141_v35 = vsel %vm118_vm0, %v140_v34, %v105_v14 }
 0x15b   :  { %v142_v36 = vmul.f32 30.0, %v141_v35 }
 0x15d   :  { %143 = vst [vmem:[#allocation5] sm:$0xff] %v142_v36 }
 0x15e   :  { %154 = dma.vmem_to_hbm [thread:$0]  %s150_s2, 128, %s152_s24, [#allocation4]  }
 0x15f   :  { %259 = dma.done.wait [#allocation4], 128  }
 0x160   :  { %260 = vsyncadd [#allocation4], 4294967168 }
 0x161   :  { %159 = vsyncpa [#allocation3], 1 }
 0x162   :  { %160 = vsyncpa [#allocation4], 1 }

</bundles_post_ra>
